<compile_context>
chip_gen: v7x
topology: tpu7x:2x2x1
jax: 0.10.0
libtpu: 0.0.40
codegen_flags: <defaults>
</compile_context>

<pallas_src>
import jax
import jax.numpy as jnp
import numpy as np
from jax.experimental import pallas as pl
from jax.experimental.pallas import tpu as pltpu

LEAKY_SLOPE = 0.2
GN_EPS = 1e-5


# -----------------------------------------------------------------------------
# Parameter preparation (glue, runs in plain JAX)
# -----------------------------------------------------------------------------
def _spectral_normalize(w, n_iter=50):
    """Divide conv weight by its largest singular value (reshaped to (out, -1)).

    NOTE: PyTorch's spectral_norm does 1 power iteration per forward with a persistent
    random `u` buffer; here power iteration is run to its fixed point (deterministic).
    """
    w_mat = w.reshape(w.shape[0], -1)
    v = jnp.ones((w_mat.shape[1],), w.dtype) / np.sqrt(w_mat.shape[1])
    u = w_mat @ v
    for _ in range(n_iter):
        u = w_mat @ v
        u = u / (jnp.linalg.norm(u) + 1e-12)
        v = w_mat.T @ u
        v = v / (jnp.linalg.norm(v) + 1e-12)
    sigma = u @ (w_mat @ v)
    return w / sigma


# -----------------------------------------------------------------------------
# Pallas kernel
# -----------------------------------------------------------------------------
def _make_kernel(offs, bs, n_valid_pad, n_pix):
    """offs: static lane offsets of the 4 conv taps (2x2 conv on space-to-depth input).
       bs  : samples packed per grid step.
       n_valid_pad: lane-dense (128-multiple) number of output columns computed.
       n_pix: number of valid output pixels (Ho*Wo) for the GroupNorm statistics."""
    inv_n = 1.0 / float(n_pix)

    def _group_norm_leaky(y, mask_col, gmat, gamma, beta):
        # y: (C, n_valid_pad) f32.  Masked pixel reduction on the (otherwise idle) MXU,
        # then the tiny (C,C)@(C,1) group-average mix; all stats stay in f32.
        s = jnp.dot(y, mask_col, preferred_element_type=jnp.float32)        # (C,1)
        ss = jnp.dot(y * y, mask_col, preferred_element_type=jnp.float32)   # (C,1)
        gs = jnp.dot(gmat, s, preferred_element_type=jnp.float32)           # group sum
        gss = jnp.dot(gmat, ss, preferred_element_type=jnp.float32)         # group sumsq
        mean = gs * inv_n
        var = gss * inv_n - mean * mean
        inv = jax.lax.rsqrt(var + GN_EPS)
        scale = inv * gamma                    # (C,1) — fold affine into one FMA
        shift = beta - mean * scale            # (C,1)
        yn = y * scale + shift
        return jnp.where(yn > 0, yn, LEAKY_SLOPE * yn)

    def kernel(xs_ref, w1_ref, vec_ref, w2_ref, gmat_ref, mask_ref, o_ref):
        # xs_ref  : (bs, 4*Cin, sp_pad)      bf16 space-to-depth(2) of padded input
        # w1_ref  : (4, Cout, 4*Cin)         bf16 per-quadrant 4x4-conv weights
        # vec_ref : (5, Cout, 1)             f32  [b1, g1, be1, g2, be2]
        # w2_ref  : (Cout, Cout)             f32  1x1 conv weight (out, in)
        # gmat_ref: (Cout, Cout)             f32  group-averaging matrix
        # mask_ref: (n_valid_pad, 1)         f32  1.0 on valid output columns
        # o_ref   : (bs, Cout, n_valid_pad)  lane-dense, channels-major (NCHW-flat) output
        mask_col = mask_ref[...]
        gmat = gmat_ref[...]
        w2 = w2_ref[...]
        b1 = vec_ref[0]
        g1 = vec_ref[1]
        be1 = vec_ref[2]
        g2 = vec_ref[3]
        be2 = vec_ref[4]

        for s in range(bs):        # static unroll over the samples packed in this step
            # 4x4/s2 conv == 2x2/s1 conv on the space-to-depth input:
            # 4 accumulating K=4*Cin MXU dots, no (16*Cin, n) concat buffer.
            acc = jnp.dot(w1_ref[0],
                          xs_ref[s, :, offs[0]:offs[0] + n_valid_pad],
                          preferred_element_type=jnp.float32)
            for q in range(1, 4):
                acc += jnp.dot(w1_ref[q],
                               xs_ref[s, :, offs[q]:offs[q] + n_valid_pad],
                               preferred_element_type=jnp.float32)
            y = acc + b1

            # GroupNorm + LeakyReLU (DownBlock tail)
            y = _group_norm_leaky(y, mask_col, gmat, g1, be1)

            # 1x1 conv (no bias) + GroupNorm + LeakyReLU (patch tail)
            y2 = jnp.dot(w2, y, preferred_element_type=jnp.float32)
            y2 = _group_norm_leaky(y2, mask_col, gmat, g2, be2)

            o_ref[s] = y2.astype(o_ref.dtype)

    return kernel


# -----------------------------------------------------------------------------
# Wrapper
# -----------------------------------------------------------------------------
def down_block_patch_forward(x_nchw, params):
    B, c_in, H, W = x_nchw.shape
    Ho, Wo = H // 2, W // 2
    Hp, Wp = H + 2, W + 2
    Hp2, Wp2 = Hp // 2, Wp // 2
    n_valid = Ho * Wp2                               # output columns actually used
    n_pix = Ho * Wo                                  # valid output pixels (GN stats)
    n_valid_pad = ((n_valid + 127) // 128) * 128     # lane-dense output width
    max_off = Wp2 + 1
    sp = Hp2 * Wp2
    sp_pad = ((n_valid_pad + max_off + 127) // 128) * 128   # tap slices stay in-bounds

    w1 = _spectral_normalize(params["w1"])           # (Cout, Cin, 4, 4)
    w2 = _spectral_normalize(params["w2"])           # (Cout, Cout, 1, 1)
    c_out = w1.shape[0]

    # ---- input prep: pad=1 + space-to-depth(2) + flatten spatial, cast to bf16 ----
    x_pad = jnp.pad(x_nchw, ((0, 0), (0, 0), (1, 1), (1, 1)))        # (B,Cin,Hp,Wp)
    xs = x_pad.reshape(B, c_in, Hp2, 2, Wp2, 2)
    xs = jnp.transpose(xs, (0, 3, 5, 1, 2, 4))                       # (B,pr,pc,Cin,Hp2,Wp2)
    xs = xs.reshape(B, 4 * c_in, sp)                                 # channel = (pr,pc,c)
    xs = jnp.pad(xs, ((0, 0), (0, 0), (0, sp_pad - sp))).astype(jnp.bfloat16)

    # ---- per-quadrant weights: 4x4/s2 conv == 2x2/s1 conv on the s2d input ----
    offs, wq_list = [], []
    for qi in range(2):
        for qj in range(2):
            wq = w1[:, :, 2 * qi:2 * qi + 2, 2 * qj:2 * qj + 2]      # (Cout,Cin,pr,pc)
            wq = jnp.transpose(wq, (0, 2, 3, 1)).reshape(c_out, 4 * c_in)
            wq_list.append(wq)
            offs.append(qi * Wp2 + qj)
    w1q = jnp.stack(wq_list, axis=0).astype(jnp.bfloat16)            # (4, Cout, 4*Cin)
    w2m = w2[:, :, 0, 0].astype(jnp.float32)                         # (Cout, Cout)

    groups = c_out // 2
    cg = c_out // groups
    gidx = jnp.arange(c_out) // cg
    gmat = (gidx[:, None] == gidx[None, :]).astype(jnp.float32) / cg  # (C, C)

    # mask column for the MXU pixel reduction: valid iff (col < Wo) and (j < n_valid)
    j = jnp.arange(n_valid_pad)
    mask_col = (((j % Wp2) < Wo) & (j < n_valid)).astype(jnp.float32)
    mask_col = mask_col.reshape(n_valid_pad, 1)

    # pack the five (C,) vectors into a single input -> one DMA descriptor
    vecs = jnp.stack([params["b1"], params["g1"], params["be1"],
                      params["g2"], params["be2"]], axis=0).astype(jnp.float32)
    vecs = vecs[:, :, None]                                          # (5, Cout, 1)

    # samples per grid step: amortize the ~0.35us fixed per-step overhead at small shapes
    bs = 2 if (B % 2 == 0) else 1

    kernel = _make_kernel(tuple(offs), bs, n_valid_pad, n_pix)

    out_flat = pl.pallas_call(
        kernel,
        out_shape=jax.ShapeDtypeStruct((B, c_out, n_valid_pad), x_nchw.dtype),
        grid_spec=pltpu.PrefetchScalarGridSpec(
            num_scalar_prefetch=0,
            grid=(B // bs,),
            in_specs=[
                pl.BlockSpec((bs, 4 * c_in, sp_pad), lambda b: (b, 0, 0)),   # xs (bf16)
                pl.BlockSpec((4, c_out, 4 * c_in), lambda b: (0, 0, 0)),     # w1q (bf16)
                pl.BlockSpec((5, c_out, 1), lambda b: (0, 0, 0)),            # packed vecs
                pl.BlockSpec((c_out, c_out), lambda b: (0, 0)),              # w2
                pl.BlockSpec((c_out, c_out), lambda b: (0, 0)),              # gmat
                pl.BlockSpec((n_valid_pad, 1), lambda b: (0, 0)),            # mask column
            ],
            out_specs=pl.BlockSpec((bs, c_out, n_valid_pad), lambda b: (b, 0, 0)),
        ),
        compiler_params=pltpu.CompilerParams(dimension_semantics=("parallel",)),
    )(xs, w1q, vecs, w2m, gmat, mask_col)

    # lane-dense slab -> drop padded columns + the wrap column; already NCHW-ordered.
    out = out_flat[:, :, :n_valid].reshape(B, c_out, Ho, Wp2)[:, :, :, :Wo]
    return out


# -----------------------------------------------------------------------------
# Pure-JAX reference (correctness check only; HIGHEST-precision convs)
# -----------------------------------------------------------------------------
def _ref_group_norm(x, groups, gamma, beta):
    B, C, H, W = x.shape
    xg = x.reshape(B, groups, C // groups, H, W)
    mean = xg.mean(axis=(2, 3, 4), keepdims=True)
    var = ((xg - mean) ** 2).mean(axis=(2, 3, 4), keepdims=True)
    xn = ((xg - mean) / jnp.sqrt(var + GN_EPS)).reshape(B, C, H, W)
    return xn * gamma[None, :, None, None] + beta[None, :, None, None]


def reference_forward(x_nchw, params):
    w1 = _spectral_normalize(params["w1"])
    w2 = _spectral_normalize(params["w2"])
    c_out = w1.shape[0]
    leaky = lambda v: jnp.where(v > 0, v, LEAKY_SLOPE * v)

    y = jax.lax.conv_general_dilated(
        x_nchw, w1, window_strides=(2, 2), padding=((1, 1), (1, 1)),
        dimension_numbers=("NCHW", "OIHW", "NCHW"),
        precision=jax.lax.Precision.HIGHEST)
    y = y + params["b1"][None, :, None, None]
    y = leaky(_ref_group_norm(y, c_out // 2, params["g1"], params["be1"]))

    y2 = jax.lax.conv_general_dilated(
        y, w2, window_strides=(1, 1), padding=((0, 0), (0, 0)),
        dimension_numbers=("NCHW", "OIHW", "NCHW"),
        precision=jax.lax.Precision.HIGHEST)
    y2 = leaky(_ref_group_norm(y2, c_out // 2, params["g2"], params["be2"]))
    return y2


# -----------------------------------------------------------------------------
if __name__ == "__main__":
    key = jax.random.PRNGKey(0)
    B, c_in, H, W = 2, 4, 16, 16
    c_out = 8
    ks = jax.random.split(key, 8)

    x = jax.random.normal(ks[0], (B, c_in, H, W), jnp.float32)
    params = {
        "w1": 0.1 * jax.random.normal(ks[1], (c_out, c_in, 4, 4), jnp.float32),
        "b1": 0.1 * jax.random.normal(ks[2], (c_out,), jnp.float32),
        "g1": 1.0 + 0.1 * jax.random.normal(ks[3], (c_out,), jnp.float32),
        "be1": 0.1 * jax.random.normal(ks[4], (c_out,), jnp.float32),
        "w2": 0.1 * jax.random.normal(ks[5], (c_out, c_out, 1, 1), jnp.float32),
        "g2": 1.0 + 0.1 * jax.random.normal(ks[6], (c_out,), jnp.float32),
        "be2": 0.1 * jax.random.normal(ks[7], (c_out,), jnp.float32),
    }

    out = down_block_patch_forward(x, params)
    out = jax.block_until_ready(out)
    assert out.shape == (B, c_out, H // 2, W // 2)

    # Tolerance is relaxed slightly vs. the f32-HIGHEST reference because the conv
    # matmul operands are bf16 on the MXU (review-requested); structural/offset bugs
    # would still produce O(1) errors and fail this check.
    ref = reference_forward(x, params)
    np.testing.assert_allclose(np.asarray(out), np.asarray(ref),
                               rtol=5e-2, atol=5e-2)
    print("KERNEL_OK")
</pallas_src>

<mosaic_0001>
module attributes {stable_mosaic.version = 11 : i64} {
  func.func @kernel(%arg0: i32, %arg1: memref<2x16x256xbf16, #tpu.memory_space<vmem>>, %arg2: memref<4x8x16xbf16, #tpu.memory_space<vmem>>, %arg3: memref<5x8x1xf32, #tpu.memory_space<vmem>>, %arg4: memref<8x8xf32, #tpu.memory_space<vmem>>, %arg5: memref<8x8xf32, #tpu.memory_space<vmem>>, %arg6: memref<128x1xf32, #tpu.memory_space<vmem>>, %arg7: memref<2x8x128xf32, #tpu.memory_space<vmem>>) attributes {dimension_semantics = [#tpu.dimension_semantics<parallel>], iteration_bounds = array<i64: 1>, scalar_prefetch = 0 : i64, scratch_operands = 0 : i64, tpu.core_type = #tpu.core_type<tc>, window_params = [{transform_indices = @transform_0, window_bounds = array<i64: 2, 16, 256>}, {pipeline_mode = #tpu.pipeline_mode<synchronous>, transform_indices = @transform_1, window_bounds = array<i64: 4, 8, 16>}, {pipeline_mode = #tpu.pipeline_mode<synchronous>, transform_indices = @transform_2, window_bounds = array<i64: 5, 8, 1>}, {pipeline_mode = #tpu.pipeline_mode<synchronous>, transform_indices = @transform_3, window_bounds = array<i64: 8, 8>}, {pipeline_mode = #tpu.pipeline_mode<synchronous>, transform_indices = @transform_4, window_bounds = array<i64: 8, 8>}, {pipeline_mode = #tpu.pipeline_mode<synchronous>, transform_indices = @transform_5, window_bounds = array<i64: 128, 1>}, {transform_indices = @transform_6, window_bounds = array<i64: 2, 8, 128>}]} {
    %c0 = arith.constant 0 : index
    %c0_0 = arith.constant 0 : index
    %0 = vector.load %arg6[%c0, %c0_0] : memref<128x1xf32, #tpu.memory_space<vmem>>, vector<128x1xf32>
    %c0_1 = arith.constant 0 : index
    %c0_2 = arith.constant 0 : index
    %1 = vector.load %arg5[%c0_1, %c0_2] : memref<8x8xf32, #tpu.memory_space<vmem>>, vector<8x8xf32>
    %c0_3 = arith.constant 0 : index
    %c0_4 = arith.constant 0 : index
    %2 = vector.load %arg4[%c0_3, %c0_4] : memref<8x8xf32, #tpu.memory_space<vmem>>, vector<8x8xf32>
    %c0_5 = arith.constant 0 : index
    %c0_6 = arith.constant 0 : index
    %c0_7 = arith.constant 0 : index
    %3 = vector.load %arg3[%c0_5, %c0_6, %c0_7] : memref<5x8x1xf32, #tpu.memory_space<vmem>>, vector<1x8x1xf32>
    %4 = vector.shape_cast %3 : vector<1x8x1xf32> to vector<8x1xf32>
    %c1 = arith.constant 1 : index
    %c0_8 = arith.constant 0 : index
    %c0_9 = arith.constant 0 : index
    %5 = vector.load %arg3[%c1, %c0_8, %c0_9] : memref<5x8x1xf32, #tpu.memory_space<vmem>>, vector<1x8x1xf32>
    %6 = vector.shape_cast %5 : vector<1x8x1xf32> to vector<8x1xf32>
    %c2 = arith.constant 2 : index
    %c0_10 = arith.constant 0 : index
    %c0_11 = arith.constant 0 : index
    %7 = vector.load %arg3[%c2, %c0_10, %c0_11] : memref<5x8x1xf32, #tpu.memory_space<vmem>>, vector<1x8x1xf32>
    %8 = vector.shape_cast %7 : vector<1x8x1xf32> to vector<8x1xf32>
    %c3 = arith.constant 3 : index
    %c0_12 = arith.constant 0 : index
    %c0_13 = arith.constant 0 : index
    %9 = vector.load %arg3[%c3, %c0_12, %c0_13] : memref<5x8x1xf32, #tpu.memory_space<vmem>>, vector<1x8x1xf32>
    %10 = vector.shape_cast %9 : vector<1x8x1xf32> to vector<8x1xf32>
    %c4 = arith.constant 4 : index
    %c0_14 = arith.constant 0 : index
    %c0_15 = arith.constant 0 : index
    %11 = vector.load %arg3[%c4, %c0_14, %c0_15] : memref<5x8x1xf32, #tpu.memory_space<vmem>>, vector<1x8x1xf32>
    %12 = vector.shape_cast %11 : vector<1x8x1xf32> to vector<8x1xf32>
    %c0_16 = arith.constant 0 : index
    %c0_17 = arith.constant 0 : index
    %c0_18 = arith.constant 0 : index
    %13 = vector.load %arg2[%c0_16, %c0_17, %c0_18] : memref<4x8x16xbf16, #tpu.memory_space<vmem>>, vector<1x8x16xbf16>
    %14 = vector.shape_cast %13 : vector<1x8x16xbf16> to vector<8x16xbf16>
    %c0_19 = arith.constant 0 : index
    %c0_20 = arith.constant 0 : index
    %c0_21 = arith.constant 0 : index
    %15 = vector.load %arg1[%c0_19, %c0_20, %c0_21] : memref<2x16x256xbf16, #tpu.memory_space<vmem>>, vector<1x16x128xbf16>
    %16 = vector.shape_cast %15 : vector<1x16x128xbf16> to vector<16x128xbf16>
    %cst = arith.constant dense<0.000000e+00> : vector<8x128xf32>
    %17 = tpu.matmul %14, %16, %cst {dimension_numbers = #tpu.dot_dimension_numbers<[1], [0], [0], [1], [0, 0, 1, 1], [], []>} : vector<8x16xbf16>, vector<16x128xbf16>, vector<8x128xf32> -> vector<8x128xf32>
    %c1_22 = arith.constant 1 : index
    %c0_23 = arith.constant 0 : index
    %c0_24 = arith.constant 0 : index
    %18 = vector.load %arg2[%c1_22, %c0_23, %c0_24] : memref<4x8x16xbf16, #tpu.memory_space<vmem>>, vector<1x8x16xbf16>
    %19 = vector.shape_cast %18 : vector<1x8x16xbf16> to vector<8x16xbf16>
    %c0_25 = arith.constant 0 : index
    %c0_26 = arith.constant 0 : index
    %c1_27 = arith.constant 1 : index
    %20 = vector.load %arg1[%c0_25, %c0_26, %c1_27] : memref<2x16x256xbf16, #tpu.memory_space<vmem>>, vector<1x16x128xbf16>
    %21 = vector.shape_cast %20 : vector<1x16x128xbf16> to vector<16x128xbf16>
    %cst_28 = arith.constant dense<0.000000e+00> : vector<8x128xf32>
    %22 = tpu.matmul %19, %21, %cst_28 {dimension_numbers = #tpu.dot_dimension_numbers<[1], [0], [0], [1], [0, 0, 1, 1], [], []>} : vector<8x16xbf16>, vector<16x128xbf16>, vector<8x128xf32> -> vector<8x128xf32>
    %23 = arith.addf %17, %22 : vector<8x128xf32>
    %c2_29 = arith.constant 2 : index
    %c0_30 = arith.constant 0 : index
    %c0_31 = arith.constant 0 : index
    %24 = vector.load %arg2[%c2_29, %c0_30, %c0_31] : memref<4x8x16xbf16, #tpu.memory_space<vmem>>, vector<1x8x16xbf16>
    %25 = vector.shape_cast %24 : vector<1x8x16xbf16> to vector<8x16xbf16>
    %c0_32 = arith.constant 0 : index
    %c0_33 = arith.constant 0 : index
    %c9 = arith.constant 9 : index
    %26 = vector.load %arg1[%c0_32, %c0_33, %c9] : memref<2x16x256xbf16, #tpu.memory_space<vmem>>, vector<1x16x128xbf16>
    %27 = vector.shape_cast %26 : vector<1x16x128xbf16> to vector<16x128xbf16>
    %cst_34 = arith.constant dense<0.000000e+00> : vector<8x128xf32>
    %28 = tpu.matmul %25, %27, %cst_34 {dimension_numbers = #tpu.dot_dimension_numbers<[1], [0], [0], [1], [0, 0, 1, 1], [], []>} : vector<8x16xbf16>, vector<16x128xbf16>, vector<8x128xf32> -> vector<8x128xf32>
    %29 = arith.addf %23, %28 : vector<8x128xf32>
    %c3_35 = arith.constant 3 : index
    %c0_36 = arith.constant 0 : index
    %c0_37 = arith.constant 0 : index
    %30 = vector.load %arg2[%c3_35, %c0_36, %c0_37] : memref<4x8x16xbf16, #tpu.memory_space<vmem>>, vector<1x8x16xbf16>
    %31 = vector.shape_cast %30 : vector<1x8x16xbf16> to vector<8x16xbf16>
    %c0_38 = arith.constant 0 : index
    %c0_39 = arith.constant 0 : index
    %c10 = arith.constant 10 : index
    %32 = vector.load %arg1[%c0_38, %c0_39, %c10] : memref<2x16x256xbf16, #tpu.memory_space<vmem>>, vector<1x16x128xbf16>
    %33 = vector.shape_cast %32 : vector<1x16x128xbf16> to vector<16x128xbf16>
    %cst_40 = arith.constant dense<0.000000e+00> : vector<8x128xf32>
    %34 = tpu.matmul %31, %33, %cst_40 {dimension_numbers = #tpu.dot_dimension_numbers<[1], [0], [0], [1], [0, 0, 1, 1], [], []>} : vector<8x16xbf16>, vector<16x128xbf16>, vector<8x128xf32> -> vector<8x128xf32>
    %35 = arith.addf %29, %34 : vector<8x128xf32>
    %36 = vector.broadcast %4 : vector<8x1xf32> to vector<8x128xf32>
    %37 = arith.addf %35, %36 : vector<8x128xf32>
    %cst_41 = arith.constant dense<0.000000e+00> : vector<8x1xf32>
    %38 = tpu.matmul %37, %0, %cst_41 {dimension_numbers = #tpu.dot_dimension_numbers<[1], [0], [0], [1], [0, 0, 1, 1], [], []>} : vector<8x128xf32>, vector<128x1xf32>, vector<8x1xf32> -> vector<8x1xf32>
    %39 = arith.mulf %37, %37 : vector<8x128xf32>
    %cst_42 = arith.constant dense<0.000000e+00> : vector<8x1xf32>
    %40 = tpu.matmul %39, %0, %cst_42 {dimension_numbers = #tpu.dot_dimension_numbers<[1], [0], [0], [1], [0, 0, 1, 1], [], []>} : vector<8x128xf32>, vector<128x1xf32>, vector<8x1xf32> -> vector<8x1xf32>
    %cst_43 = arith.constant dense<0.000000e+00> : vector<8x1xf32>
    %41 = tpu.matmul %1, %38, %cst_43 {dimension_numbers = #tpu.dot_dimension_numbers<[1], [0], [0], [1], [0, 0, 1, 1], [], []>} : vector<8x8xf32>, vector<8x1xf32>, vector<8x1xf32> -> vector<8x1xf32>
    %cst_44 = arith.constant dense<0.000000e+00> : vector<8x1xf32>
    %42 = tpu.matmul %1, %40, %cst_44 {dimension_numbers = #tpu.dot_dimension_numbers<[1], [0], [0], [1], [0, 0, 1, 1], [], []>} : vector<8x8xf32>, vector<8x1xf32>, vector<8x1xf32> -> vector<8x1xf32>
    %cst_45 = arith.constant 1.562500e-02 : f32
    %43 = vector.broadcast %cst_45 : f32 to vector<8x1xf32>
    %44 = arith.mulf %41, %43 : vector<8x1xf32>
    %cst_46 = arith.constant 1.562500e-02 : f32
    %45 = vector.broadcast %cst_46 : f32 to vector<8x1xf32>
    %46 = arith.mulf %42, %45 : vector<8x1xf32>
    %47 = arith.mulf %44, %44 : vector<8x1xf32>
    %48 = arith.subf %46, %47 : vector<8x1xf32>
    %cst_47 = arith.constant 9.99999974E-6 : f32
    %49 = vector.broadcast %cst_47 : f32 to vector<8x1xf32>
    %50 = arith.addf %48, %49 : vector<8x1xf32>
    %51 = math.rsqrt %50 : vector<8x1xf32>
    %52 = arith.mulf %51, %6 : vector<8x1xf32>
    %53 = arith.mulf %44, %52 : vector<8x1xf32>
    %54 = arith.subf %8, %53 : vector<8x1xf32>
    %55 = vector.broadcast %52 : vector<8x1xf32> to vector<8x128xf32>
    %56 = arith.mulf %37, %55 : vector<8x128xf32>
    %57 = vector.broadcast %54 : vector<8x1xf32> to vector<8x128xf32>
    %58 = arith.addf %56, %57 : vector<8x128xf32>
    %cst_48 = arith.constant 0.000000e+00 : f32
    %59 = vector.broadcast %cst_48 : f32 to vector<8x128xf32>
    %60 = arith.cmpf ogt, %58, %59 : vector<8x128xf32>
    %cst_49 = arith.constant 2.000000e-01 : f32
    %61 = vector.broadcast %cst_49 : f32 to vector<8x128xf32>
    %62 = arith.mulf %61, %58 : vector<8x128xf32>
    %63 = arith.select %60, %58, %62 : vector<8x128xi1>, vector<8x128xf32>
    %cst_50 = arith.constant dense<0.000000e+00> : vector<8x128xf32>
    %64 = tpu.matmul %2, %63, %cst_50 {dimension_numbers = #tpu.dot_dimension_numbers<[1], [0], [0], [1], [0, 0, 1, 1], [], []>} : vector<8x8xf32>, vector<8x128xf32>, vector<8x128xf32> -> vector<8x128xf32>
    %cst_51 = arith.constant dense<0.000000e+00> : vector<8x1xf32>
    %65 = tpu.matmul %64, %0, %cst_51 {dimension_numbers = #tpu.dot_dimension_numbers<[1], [0], [0], [1], [0, 0, 1, 1], [], []>} : vector<8x128xf32>, vector<128x1xf32>, vector<8x1xf32> -> vector<8x1xf32>
    %66 = arith.mulf %64, %64 : vector<8x128xf32>
    %cst_52 = arith.constant dense<0.000000e+00> : vector<8x1xf32>
    %67 = tpu.matmul %66, %0, %cst_52 {dimension_numbers = #tpu.dot_dimension_numbers<[1], [0], [0], [1], [0, 0, 1, 1], [], []>} : vector<8x128xf32>, vector<128x1xf32>, vector<8x1xf32> -> vector<8x1xf32>
    %cst_53 = arith.constant dense<0.000000e+00> : vector<8x1xf32>
    %68 = tpu.matmul %1, %65, %cst_53 {dimension_numbers = #tpu.dot_dimension_numbers<[1], [0], [0], [1], [0, 0, 1, 1], [], []>} : vector<8x8xf32>, vector<8x1xf32>, vector<8x1xf32> -> vector<8x1xf32>
    %cst_54 = arith.constant dense<0.000000e+00> : vector<8x1xf32>
    %69 = tpu.matmul %1, %67, %cst_54 {dimension_numbers = #tpu.dot_dimension_numbers<[1], [0], [0], [1], [0, 0, 1, 1], [], []>} : vector<8x8xf32>, vector<8x1xf32>, vector<8x1xf32> -> vector<8x1xf32>
    %cst_55 = arith.constant 1.562500e-02 : f32
    %70 = vector.broadcast %cst_55 : f32 to vector<8x1xf32>
    %71 = arith.mulf %68, %70 : vector<8x1xf32>
    %cst_56 = arith.constant 1.562500e-02 : f32
    %72 = vector.broadcast %cst_56 : f32 to vector<8x1xf32>
    %73 = arith.mulf %69, %72 : vector<8x1xf32>
    %74 = arith.mulf %71, %71 : vector<8x1xf32>
    %75 = arith.subf %73, %74 : vector<8x1xf32>
    %cst_57 = arith.constant 9.99999974E-6 : f32
    %76 = vector.broadcast %cst_57 : f32 to vector<8x1xf32>
    %77 = arith.addf %75, %76 : vector<8x1xf32>
    %78 = math.rsqrt %77 : vector<8x1xf32>
    %79 = arith.mulf %78, %10 : vector<8x1xf32>
    %80 = arith.mulf %71, %79 : vector<8x1xf32>
    %81 = arith.subf %12, %80 : vector<8x1xf32>
    %82 = vector.broadcast %79 : vector<8x1xf32> to vector<8x128xf32>
    %83 = arith.mulf %64, %82 : vector<8x128xf32>
    %84 = vector.broadcast %81 : vector<8x1xf32> to vector<8x128xf32>
    %85 = arith.addf %83, %84 : vector<8x128xf32>
    %cst_58 = arith.constant 0.000000e+00 : f32
    %86 = vector.broadcast %cst_58 : f32 to vector<8x128xf32>
    %87 = arith.cmpf ogt, %85, %86 : vector<8x128xf32>
    %cst_59 = arith.constant 2.000000e-01 : f32
    %88 = vector.broadcast %cst_59 : f32 to vector<8x128xf32>
    %89 = arith.mulf %88, %85 : vector<8x128xf32>
    %90 = arith.select %87, %85, %89 : vector<8x128xi1>, vector<8x128xf32>
    %c0_60 = arith.constant 0 : index
    %c0_61 = arith.constant 0 : index
    %c0_62 = arith.constant 0 : index
    %91 = vector.load %arg7[%c0_60, %c0_61, %c0_62] : memref<2x8x128xf32, #tpu.memory_space<vmem>>, vector<1x8x128xf32>
    %92 = vector.shape_cast %91 : vector<1x8x128xf32> to vector<8x128xf32>
    %93 = vector.shape_cast %90 : vector<8x128xf32> to vector<1x8x128xf32>
    tpu.vector_store %arg7[%c0_60, %c0_61, %c0_62], %93 {strides = array<i32>} : memref<2x8x128xf32, #tpu.memory_space<vmem>>, vector<1x8x128xf32>,
    %c0_63 = arith.constant 0 : index
    %c0_64 = arith.constant 0 : index
    %c0_65 = arith.constant 0 : index
    %94 = vector.load %arg2[%c0_63, %c0_64, %c0_65] : memref<4x8x16xbf16, #tpu.memory_space<vmem>>, vector<1x8x16xbf16>
    %95 = vector.shape_cast %94 : vector<1x8x16xbf16> to vector<8x16xbf16>
    %c1_66 = arith.constant 1 : index
    %c0_67 = arith.constant 0 : index
    %c0_68 = arith.constant 0 : index
    %96 = vector.load %arg1[%c1_66, %c0_67, %c0_68] : memref<2x16x256xbf16, #tpu.memory_space<vmem>>, vector<1x16x128xbf16>
    %97 = vector.shape_cast %96 : vector<1x16x128xbf16> to vector<16x128xbf16>
    %cst_69 = arith.constant dense<0.000000e+00> : vector<8x128xf32>
    %98 = tpu.matmul %95, %97, %cst_69 {dimension_numbers = #tpu.dot_dimension_numbers<[1], [0], [0], [1], [0, 0, 1, 1], [], []>} : vector<8x16xbf16>, vector<16x128xbf16>, vector<8x128xf32> -> vector<8x128xf32>
    %c1_70 = arith.constant 1 : index
    %c0_71 = arith.constant 0 : index
    %c0_72 = arith.constant 0 : index
    %99 = vector.load %arg2[%c1_70, %c0_71, %c0_72] : memref<4x8x16xbf16, #tpu.memory_space<vmem>>, vector<1x8x16xbf16>
    %100 = vector.shape_cast %99 : vector<1x8x16xbf16> to vector<8x16xbf16>
    %c1_73 = arith.constant 1 : index
    %c0_74 = arith.constant 0 : index
    %c1_75 = arith.constant 1 : index
    %101 = vector.load %arg1[%c1_73, %c0_74, %c1_75] : memref<2x16x256xbf16, #tpu.memory_space<vmem>>, vector<1x16x128xbf16>
    %102 = vector.shape_cast %101 : vector<1x16x128xbf16> to vector<16x128xbf16>
    %cst_76 = arith.constant dense<0.000000e+00> : vector<8x128xf32>
    %103 = tpu.matmul %100, %102, %cst_76 {dimension_numbers = #tpu.dot_dimension_numbers<[1], [0], [0], [1], [0, 0, 1, 1], [], []>} : vector<8x16xbf16>, vector<16x128xbf16>, vector<8x128xf32> -> vector<8x128xf32>
    %104 = arith.addf %98, %103 : vector<8x128xf32>
    %c2_77 = arith.constant 2 : index
    %c0_78 = arith.constant 0 : index
    %c0_79 = arith.constant 0 : index
    %105 = vector.load %arg2[%c2_77, %c0_78, %c0_79] : memref<4x8x16xbf16, #tpu.memory_space<vmem>>, vector<1x8x16xbf16>
    %106 = vector.shape_cast %105 : vector<1x8x16xbf16> to vector<8x16xbf16>
    %c1_80 = arith.constant 1 : index
    %c0_81 = arith.constant 0 : index
    %c9_82 = arith.constant 9 : index
    %107 = vector.load %arg1[%c1_80, %c0_81, %c9_82] : memref<2x16x256xbf16, #tpu.memory_space<vmem>>, vector<1x16x128xbf16>
    %108 = vector.shape_cast %107 : vector<1x16x128xbf16> to vector<16x128xbf16>
    %cst_83 = arith.constant dense<0.000000e+00> : vector<8x128xf32>
    %109 = tpu.matmul %106, %108, %cst_83 {dimension_numbers = #tpu.dot_dimension_numbers<[1], [0], [0], [1], [0, 0, 1, 1], [], []>} : vector<8x16xbf16>, vector<16x128xbf16>, vector<8x128xf32> -> vector<8x128xf32>
    %110 = arith.addf %104, %109 : vector<8x128xf32>
    %c3_84 = arith.constant 3 : index
    %c0_85 = arith.constant 0 : index
    %c0_86 = arith.constant 0 : index
    %111 = vector.load %arg2[%c3_84, %c0_85, %c0_86] : memref<4x8x16xbf16, #tpu.memory_space<vmem>>, vector<1x8x16xbf16>
    %112 = vector.shape_cast %111 : vector<1x8x16xbf16> to vector<8x16xbf16>
    %c1_87 = arith.constant 1 : index
    %c0_88 = arith.constant 0 : index
    %c10_89 = arith.constant 10 : index
    %113 = vector.load %arg1[%c1_87, %c0_88, %c10_89] : memref<2x16x256xbf16, #tpu.memory_space<vmem>>, vector<1x16x128xbf16>
    %114 = vector.shape_cast %113 : vector<1x16x128xbf16> to vector<16x128xbf16>
    %cst_90 = arith.constant dense<0.000000e+00> : vector<8x128xf32>
    %115 = tpu.matmul %112, %114, %cst_90 {dimension_numbers = #tpu.dot_dimension_numbers<[1], [0], [0], [1], [0, 0, 1, 1], [], []>} : vector<8x16xbf16>, vector<16x128xbf16>, vector<8x128xf32> -> vector<8x128xf32>
    %116 = arith.addf %110, %115 : vector<8x128xf32>
    %117 = vector.broadcast %4 : vector<8x1xf32> to vector<8x128xf32>
    %118 = arith.addf %116, %117 : vector<8x128xf32>
    %cst_91 = arith.constant dense<0.000000e+00> : vector<8x1xf32>
    %119 = tpu.matmul %118, %0, %cst_91 {dimension_numbers = #tpu.dot_dimension_numbers<[1], [0], [0], [1], [0, 0, 1, 1], [], []>} : vector<8x128xf32>, vector<128x1xf32>, vector<8x1xf32> -> vector<8x1xf32>
    %120 = arith.mulf %118, %118 : vector<8x128xf32>
    %cst_92 = arith.constant dense<0.000000e+00> : vector<8x1xf32>
    %121 = tpu.matmul %120, %0, %cst_92 {dimension_numbers = #tpu.dot_dimension_numbers<[1], [0], [0], [1], [0, 0, 1, 1], [], []>} : vector<8x128xf32>, vector<128x1xf32>, vector<8x1xf32> -> vector<8x1xf32>
    %cst_93 = arith.constant dense<0.000000e+00> : vector<8x1xf32>
    %122 = tpu.matmul %1, %119, %cst_93 {dimension_numbers = #tpu.dot_dimension_numbers<[1], [0], [0], [1], [0, 0, 1, 1], [], []>} : vector<8x8xf32>, vector<8x1xf32>, vector<8x1xf32> -> vector<8x1xf32>
    %cst_94 = arith.constant dense<0.000000e+00> : vector<8x1xf32>
    %123 = tpu.matmul %1, %121, %cst_94 {dimension_numbers = #tpu.dot_dimension_numbers<[1], [0], [0], [1], [0, 0, 1, 1], [], []>} : vector<8x8xf32>, vector<8x1xf32>, vector<8x1xf32> -> vector<8x1xf32>
    %cst_95 = arith.constant 1.562500e-02 : f32
    %124 = vector.broadcast %cst_95 : f32 to vector<8x1xf32>
    %125 = arith.mulf %122, %124 : vector<8x1xf32>
    %cst_96 = arith.constant 1.562500e-02 : f32
    %126 = vector.broadcast %cst_96 : f32 to vector<8x1xf32>
    %127 = arith.mulf %123, %126 : vector<8x1xf32>
    %128 = arith.mulf %125, %125 : vector<8x1xf32>
    %129 = arith.subf %127, %128 : vector<8x1xf32>
    %cst_97 = arith.constant 9.99999974E-6 : f32
    %130 = vector.broadcast %cst_97 : f32 to vector<8x1xf32>
    %131 = arith.addf %129, %130 : vector<8x1xf32>
    %132 = math.rsqrt %131 : vector<8x1xf32>
    %133 = arith.mulf %132, %6 : vector<8x1xf32>
    %134 = arith.mulf %125, %133 : vector<8x1xf32>
    %135 = arith.subf %8, %134 : vector<8x1xf32>
    %136 = vector.broadcast %133 : vector<8x1xf32> to vector<8x128xf32>
    %137 = arith.mulf %118, %136 : vector<8x128xf32>
    %138 = vector.broadcast %135 : vector<8x1xf32> to vector<8x128xf32>
    %139 = arith.addf %137, %138 : vector<8x128xf32>
    %cst_98 = arith.constant 0.000000e+00 : f32
    %140 = vector.broadcast %cst_98 : f32 to vector<8x128xf32>
    %141 = arith.cmpf ogt, %139, %140 : vector<8x128xf32>
    %cst_99 = arith.constant 2.000000e-01 : f32
    %142 = vector.broadcast %cst_99 : f32 to vector<8x128xf32>
    %143 = arith.mulf %142, %139 : vector<8x128xf32>
    %144 = arith.select %141, %139, %143 : vector<8x128xi1>, vector<8x128xf32>
    %cst_100 = arith.constant dense<0.000000e+00> : vector<8x128xf32>
    %145 = tpu.matmul %2, %144, %cst_100 {dimension_numbers = #tpu.dot_dimension_numbers<[1], [0], [0], [1], [0, 0, 1, 1], [], []>} : vector<8x8xf32>, vector<8x128xf32>, vector<8x128xf32> -> vector<8x128xf32>
    %cst_101 = arith.constant dense<0.000000e+00> : vector<8x1xf32>
    %146 = tpu.matmul %145, %0, %cst_101 {dimension_numbers = #tpu.dot_dimension_numbers<[1], [0], [0], [1], [0, 0, 1, 1], [], []>} : vector<8x128xf32>, vector<128x1xf32>, vector<8x1xf32> -> vector<8x1xf32>
    %147 = arith.mulf %145, %145 : vector<8x128xf32>
    %cst_102 = arith.constant dense<0.000000e+00> : vector<8x1xf32>
    %148 = tpu.matmul %147, %0, %cst_102 {dimension_numbers = #tpu.dot_dimension_numbers<[1], [0], [0], [1], [0, 0, 1, 1], [], []>} : vector<8x128xf32>, vector<128x1xf32>, vector<8x1xf32> -> vector<8x1xf32>
    %cst_103 = arith.constant dense<0.000000e+00> : vector<8x1xf32>
    %149 = tpu.matmul %1, %146, %cst_103 {dimension_numbers = #tpu.dot_dimension_numbers<[1], [0], [0], [1], [0, 0, 1, 1], [], []>} : vector<8x8xf32>, vector<8x1xf32>, vector<8x1xf32> -> vector<8x1xf32>
    %cst_104 = arith.constant dense<0.000000e+00> : vector<8x1xf32>
    %150 = tpu.matmul %1, %148, %cst_104 {dimension_numbers = #tpu.dot_dimension_numbers<[1], [0], [0], [1], [0, 0, 1, 1], [], []>} : vector<8x8xf32>, vector<8x1xf32>, vector<8x1xf32> -> vector<8x1xf32>
    %cst_105 = arith.constant 1.562500e-02 : f32
    %151 = vector.broadcast %cst_105 : f32 to vector<8x1xf32>
    %152 = arith.mulf %149, %151 : vector<8x1xf32>
    %cst_106 = arith.constant 1.562500e-02 : f32
    %153 = vector.broadcast %cst_106 : f32 to vector<8x1xf32>
    %154 = arith.mulf %150, %153 : vector<8x1xf32>
    %155 = arith.mulf %152, %152 : vector<8x1xf32>
    %156 = arith.subf %154, %155 : vector<8x1xf32>
    %cst_107 = arith.constant 9.99999974E-6 : f32
    %157 = vector.broadcast %cst_107 : f32 to vector<8x1xf32>
    %158 = arith.addf %156, %157 : vector<8x1xf32>
    %159 = math.rsqrt %158 : vector<8x1xf32>
    %160 = arith.mulf %159, %10 : vector<8x1xf32>
    %161 = arith.mulf %152, %160 : vector<8x1xf32>
    %162 = arith.subf %12, %161 : vector<8x1xf32>
    %163 = vector.broadcast %160 : vector<8x1xf32> to vector<8x128xf32>
    %164 = arith.mulf %145, %163 : vector<8x128xf32>
    %165 = vector.broadcast %162 : vector<8x1xf32> to vector<8x128xf32>
    %166 = arith.addf %164, %165 : vector<8x128xf32>
    %cst_108 = arith.constant 0.000000e+00 : f32
    %167 = vector.broadcast %cst_108 : f32 to vector<8x128xf32>
    %168 = arith.cmpf ogt, %166, %167 : vector<8x128xf32>
    %cst_109 = arith.constant 2.000000e-01 : f32
    %169 = vector.broadcast %cst_109 : f32 to vector<8x128xf32>
    %170 = arith.mulf %169, %166 : vector<8x128xf32>
    %171 = arith.select %168, %166, %170 : vector<8x128xi1>, vector<8x128xf32>
    %c1_110 = arith.constant 1 : index
    %c0_111 = arith.constant 0 : index
    %c0_112 = arith.constant 0 : index
    %172 = vector.load %arg7[%c1_110, %c0_111, %c0_112] : memref<2x8x128xf32, #tpu.memory_space<vmem>>, vector<1x8x128xf32>
    %173 = vector.shape_cast %172 : vector<1x8x128xf32> to vector<8x128xf32>
    %174 = vector.shape_cast %171 : vector<8x128xf32> to vector<1x8x128xf32>
    tpu.vector_store %arg7[%c1_110, %c0_111, %c0_112], %174 {strides = array<i32>} : memref<2x8x128xf32, #tpu.memory_space<vmem>>, vector<1x8x128xf32>,
    return
  }
  func.func @transform_0(%arg0: i32) -> (i32, i32, i32) {
    %c0_i32 = arith.constant 0 : i32
    %c0_i32_0 = arith.constant 0 : i32
    %c0_i32_1 = arith.constant 0 : i32
    return %arg0, %c0_i32, %c0_i32_0 : i32, i32, i32
  }
  func.func @transform_1(%arg0: i32) -> (i32, i32, i32) {
    %c0_i32 = arith.constant 0 : i32
    %c0_i32_0 = arith.constant 0 : i32
    %c0_i32_1 = arith.constant 0 : i32
    %c0_i32_2 = arith.constant 0 : i32
    return %c0_i32, %c0_i32_0, %c0_i32_1 : i32, i32, i32
  }
  func.func @transform_2(%arg0: i32) -> (i32, i32, i32) {
    %c0_i32 = arith.constant 0 : i32
    %c0_i32_0 = arith.constant 0 : i32
    %c0_i32_1 = arith.constant 0 : i32
    %c0_i32_2 = arith.constant 0 : i32
    return %c0_i32, %c0_i32_0, %c0_i32_1 : i32, i32, i32
  }
  func.func @transform_3(%arg0: i32) -> (i32, i32) {
    %c0_i32 = arith.constant 0 : i32
    %c0_i32_0 = arith.constant 0 : i32
    %c0_i32_1 = arith.constant 0 : i32
    return %c0_i32, %c0_i32_0 : i32, i32
  }
  func.func @transform_4(%arg0: i32) -> (i32, i32) {
    %c0_i32 = arith.constant 0 : i32
    %c0_i32_0 = arith.constant 0 : i32
    %c0_i32_1 = arith.constant 0 : i32
    return %c0_i32, %c0_i32_0 : i32, i32
  }
  func.func @transform_5(%arg0: i32) -> (i32, i32) {
    %c0_i32 = arith.constant 0 : i32
    %c0_i32_0 = arith.constant 0 : i32
    %c0_i32_1 = arith.constant 0 : i32
    return %c0_i32, %c0_i32_0 : i32, i32
  }
  func.func @transform_6(%arg0: i32) -> (i32, i32, i32) {
    %c0_i32 = arith.constant 0 : i32
    %c0_i32_0 = arith.constant 0 : i32
    %c0_i32_1 = arith.constant 0 : i32
    return %arg0, %c0_i32, %c0_i32_0 : i32, i32, i32
  }
}

</mosaic_0001>

<bundles_post_ra>
// kernel: tpu_custom_call.1
= control target key start
LH: loop header
LB: loop body
LE: loop exit
PB: predicated region body
PF: predicated region fallthrough
CT: control target
= control target key end

     0   :  { %s2713_s25 = smov 119   ;;  %s2714_s26 = smov 127   ;;  %v2715_v2 = vmov 0.0   ;;  %vm2716_vm0 = vmmov 0   ;;  %vm74_vm1 = vcmask 130048   ;;  %v2717_v5 = vmov 0   ;;  %s3171_s0 = inlined_call_operand.vmem [shape: bf16[2,16,256], index: 0, kind: input, shape index: {}]   ;;  %s3172_s1 = inlined_call_operand.vmem [shape: bf16[4,8,16], index: 1, kind: input, shape index: {}]   ;;  %s3173_s2 = inlined_call_operand.vmem [shape: f32[5,8,1], index: 2, kind: input, shape index: {}]   ;;  %s3174_s3 = inlined_call_operand.vmem [shape: f32[8,8], index: 3, kind: input, shape index: {}]   ;;  %s3175_s4 = inlined_call_operand.vmem [shape: f32[8,8], index: 4, kind: input, shape index: {}]   ;;  %s3176_s5 = inlined_call_operand.vmem [shape: f32[128,1], index: 5, kind: input, shape index: {}]   ;;  %s3177_s6 = inlined_call_operand.hbm [shape: f32[2,8,128], index: 6, kind: output, shape index: {}]  }
   0x1   :  { %v2673_v0 = vld [vmem:[%s3171_s0] ss:$8 sps:$4 sm:$0xff]   ;;  %v2675_v1 = vld [vmem:[%s3171_s0 + $0x4] ss:$8 sps:$4 sm:$0xff]   ;;  %2097 = vmatprep.subr.bf16.mxu1 %v2715_v2  ;;  %2091 = vmatprep.subr.bf16.mxu0 %v2715_v2 }
   0x2   :  { %169 = vrot.lane.b32.xlu1 %v2673_v0, %s2713_s25  ;;  %67 = vrot.lane.b32.xlu0 %v2673_v0, %s2714_s26  ;;  %v2676_v3 = vld [vmem:[%s3171_s0] ss:$8 sps:$4 sm:$0xff]  }
   0x3   :  { %2099 = vmatprep.mubr.msk.bf16.mxu1 %vm2716_vm0, %v2715_v2  ;;  %2093 = vmatprep.mubr.msk.bf16.mxu0 %vm2716_vm0, %v2715_v2  ;;  %v52_v4 = vld [vmem:[%s3172_s1] sm:$0xf] }
   0x4   :  { %2098 = vmatpush3.bf16.msra.mxu1 %v2676_v3  ;;  %2671 = vset.pattern.permute.xlu0 %v2717_v5 }
   0x5   :  { %2109 = vmatprep.subr.bf16.mxu1 %v2715_v2  ;;  %2672 = vset.pattern.permute.xlu1 %v2717_v5 }
   0x6   :  { %171 = vrot.lane.b32.xlu1 %v2675_v1, %s2713_s25  ;;  %69 = vrot.lane.b32.xlu0 %v2675_v1, %s2714_s26 }
   0x7   :  { %2100 = vmatmul.mubr.msk.bf16.vlgmr.msra.gmra.mrb[0].mxu1 %vm74_vm1, %v52_v4 }
   0x8   :  { %11 = vsyncpa [#allocation3], 0  ;;  %2111 = vmatprep.mubr.msk.bf16.mxu1 %vm2716_vm0, %v2715_v2  ;;  %s2718_s7 = smov 118   ;;  %v43_v6 = vld [vmem:[%s3173_s2] sm:$0xff]  ;;  %vm71_vm2 = vcmask 1039360   ;;  %vm173_vm3 = vcmask 973824  }
   0x9   :  { %v1885_v12 = vld [vmem:[%s3172_s1 + $0x4] sm:$0xf]  ;;  %vm226_vm4 = vcmask 965632   ;;  %v26_v18 = vld [vmem:[%s3176_s5 + $0x8] sm:$0xff]  ;;  %v2719_v20 = vmov 0.0|0.0   ;;  %v27_v22 = vld [vmem:[%s3176_s5 + $0x10] sm:$0xff] }
   0xa   :  { %224 = vrot.lane.b32.xlu1 %v2675_v1, %s2718_s7  ;;  %222 = vrot.lane.b32.xlu0 %v2673_v0, %s2718_s7  ;;  %v25_v17 = vld [vmem:[%s3176_s5] sm:$0xff]  ;;  %v1893_v19 = vld [vmem:[%s3172_s1 + $0xc] sm:$0xf]  ;;  %vm420_vm5 = vcmask 64512  }
   0xb   :  { %v2809_v21 = vpack.c.bf16 %v26_v18, %v25_v17  ;;  %v28_v23 = vld [vmem:[%s3176_s5 + $0x18] sm:$0xff]  ;;  %v1891_v24 = vld [vmem:[%s3172_s1 + $0x8] sm:$0xf]  ;;  %v29_v26 = vld [vmem:[%s3176_s5 + $0x20] sm:$0xff] }
   0xc   :  { %v2826_v25 = vpack.c.bf16 %v28_v23, %v27_v22  ;;  %v30_v27 = vld [vmem:[%s3176_s5 + $0x28] sm:$0xff]  ;;  %v31_v29 = vld [vmem:[%s3176_s5 + $0x30] sm:$0xff]  ;;  %v32_v30 = vld [vmem:[%s3176_s5 + $0x38] sm:$0xff] }
   0xd   :  { %v2839_v28 = vpack.c.bf16 %v30_v27, %v29_v26  ;;  %v2853_v31 = vpack.c.bf16 %v32_v30, %v31_v29  ;;  %v33_v32 = vld [vmem:[%s3176_s5 + $0x40] sm:$0xff]  ;;  %v34_v33 = vld [vmem:[%s3176_s5 + $0x48] sm:$0xff]  ;;  %v35_v35 = vld [vmem:[%s3176_s5 + $0x50] sm:$0xff] }
   0xe   :  { %275 = vperm.xlu0 %2671, %v43_v6   ;;  %v2867_v34 = vpack.c.bf16 %v34_v33, %v33_v32  ;;  %v36_v36 = vld [vmem:[%s3176_s5 + $0x58] sm:$0xff]  ;;  %v37_v38 = vld [vmem:[%s3176_s5 + $0x60] sm:$0xff]  ;;  %v38_v39 = vld [vmem:[%s3176_s5 + $0x68] sm:$0xff] }
   0xf   :  { %v2879_v37 = vpack.c.bf16 %v36_v36, %v35_v35  ;;  %v2891_v40 = vpack.c.bf16 %v38_v39, %v37_v38  ;;  %v39_v41 = vld [vmem:[%s3176_s5 + $0x70] sm:$0xff]  ;;  %v40_v42 = vld [vmem:[%s3176_s5 + $0x78] sm:$0xff]  ;;  %v2919_v3 = vld [vmem:[%s3175_s4] sm:$0xff] }
  0x10   :  { %v2903_v43 = vpack.c.bf16 %v40_v42, %v39_v41  ;;  %v2950_v17 = vld [vmem:[%s3173_s2 + $0x8] sm:$0xff]  ;;  %v2956_v22 = vld [vmem:[%s3173_s2 + $0x10] sm:$0xff]  ;;  %v2962_v33 = vld [vmem:[%s3174_s3] sm:$0xff] }
  0x11   :  { %v2677_v36 = vld [vmem:[%s3171_s0 + $0x10] ss:$8 sps:$4 sm:$0xff]   ;;  %v2679_v38 = vld [vmem:[%s3171_s0 + $0x14] ss:$8 sps:$4 sm:$0xff]  }
  0x12   :  { %982 = vrot.lane.b32.xlu0 %v2677_v36, %s2714_s26 }
  0x16   :  { %1081 = vrot.lane.b32.xlu0 %v2677_v36, %s2713_s25 }
  0x1a   :  { %1132 = vrot.lane.b32.xlu0 %v2677_v36, %s2718_s7 }
  0x74   :  { %v170_v7 = vpop.permute.xlu1 %169  ;;  %v68_v8 = vpop.permute.xlu0 %67 }
  0x78   :  { %v172_v9 = vpop.permute.xlu1 %171  ;;  %v70_v10 = vpop.permute.xlu0 %69 }
  0x79   :  { %v72_v11 = vsel %vm71_vm2, %v68_v8, %v70_v10  ;;  %v174_v15 = vsel %vm173_vm3, %v170_v7, %v172_v9 }
  0x7a   :  { %2092 = vmatpush3.bf16.msra.mxu0 %v72_v11 }
  0x7b   :  { %2103 = vmatprep.subr.bf16.mxu0 %v2715_v2 }
  0x7c   :  { %v225_v13 = vpop.permute.xlu1 %224  ;;  %v223_v14 = vpop.permute.xlu0 %222 }
  0x7d   :  { %2094 = vmatmul.mubr.msk.bf16.vlgmr.msra.gmra.mrb[0].mxu0 %vm74_vm1, %v1885_v12  ;;  %v227_v16 = vsel %vm226_vm4, %v223_v14, %v225_v13 }
  0x7e   :  { %2104 = vmatpush3.bf16.msra.mxu0 %v174_v15  ;;  %2110 = vmatpush3.bf16.msra.mxu1 %v227_v16 }
  0x7f   :  { %2105 = vmatprep.mubr.msk.bf16.mxu0 %vm2716_vm0, %v2715_v2  ;;  %2469 = vmatprep.subr.bf16.mxu0 %v2719_v20 }
  0x80   :  { %2493 = vmatprep.subr.bf16.mxu1 %v2719_v20 }
  0x81   :  { %2112 = vmatmul.mubr.msk.bf16.vlgmr.msra.gmra.mrb[4].mxu1 %vm74_vm1, %v1893_v19 }
  0x82   :  { %2495 = vmatpush3.bf16.msra.mxu1 %v2809_v21  ;;  %2182 = vmatprep.mubr.msk.f32.mxu1 %vm2716_vm0, %v2715_v2 }
  0x83   :  { %2496 = vmatprep.subr.bf16.mxu1 %v2719_v20 }
  0x85   :  { %2106 = vmatmul.mubr.msk.bf16.vlgmr.msra.gmra.mrb[4].mxu0 %vm74_vm1, %v1891_v24 }
  0x86   :  { %2471 = vmatpush3.bf16.msra.mxu0 %v2809_v21  ;;  %2498 = vmatpush3.bf16.msra.mxu1 %v2826_v25 }
  0x87   :  { %2472 = vmatprep.subr.bf16.mxu0 %v2719_v20  ;;  %2499 = vmatprep.subr.bf16.mxu1 %v2719_v20 }
  0x88   :  { %2147 = vmatprep.mubr.msk.f32.mxu0 %vm2716_vm0, %v2715_v2 }
  0x8a   :  { %2474 = vmatpush3.bf16.msra.mxu0 %v2826_v25  ;;  %2501 = vmatpush3.bf16.msra.mxu1 %v2839_v28 }
  0x8b   :  { %2475 = vmatprep.subr.bf16.mxu0 %v2719_v20  ;;  %2502 = vmatprep.subr.bf16.mxu1 %v2719_v20 }
  0x8d   :  { %v2909_v61 = vpop.permute.xlu0 %275 }
  0x8e   :  { %2477 = vmatpush3.bf16.msra.mxu0 %v2839_v28  ;;  %2504 = vmatpush3.bf16.msra.mxu1 %v2853_v31 }
  0x8f   :  { %2478 = vmatprep.subr.bf16.mxu0 %v2719_v20  ;;  %2505 = vmatprep.subr.bf16.mxu1 %v2719_v20 }
  0x92   :  { %2480 = vmatpush3.bf16.msra.mxu0 %v2853_v31  ;;  %2507 = vmatpush3.bf16.msra.mxu1 %v2867_v34 }
  0x93   :  { %2481 = vmatprep.subr.bf16.mxu0 %v2719_v20  ;;  %2508 = vmatprep.subr.bf16.mxu1 %v2719_v20 }
  0x96   :  { %2483 = vmatpush3.bf16.msra.mxu0 %v2867_v34  ;;  %2510 = vmatpush3.bf16.msra.mxu1 %v2879_v37 }
  0x97   :  { %2484 = vmatprep.subr.bf16.mxu0 %v2719_v20  ;;  %2511 = vmatprep.subr.bf16.mxu1 %v2719_v20 }
  0x9a   :  { %2486 = vmatpush3.bf16.msra.mxu0 %v2879_v37  ;;  %2513 = vmatpush3.bf16.msra.mxu1 %v2891_v40 }
  0x9b   :  { %2487 = vmatprep.subr.bf16.mxu0 %v2719_v20  ;;  %2514 = vmatprep.subr.bf16.mxu1 %v2719_v20 }
  0x9e   :  { %2489 = vmatpush3.bf16.msra.mxu0 %v2891_v40  ;;  %2516 = vmatpush3.bf16.msra.mxu1 %v2903_v43 }
  0x9f   :  { %2490 = vmatprep.subr.bf16.mxu0 %v2719_v20  ;;  %2190 = vmatprep.subr.mxu1 %v2715_v2 }
  0xa2   :  { %2492 = vmatpush3.bf16.msra.mxu0 %v2903_v43 }
  0xa3   :  { %2185 = vmatprep.subr.mxu0 %v2715_v2 }
  0xda   :  { %v161_v44 = vpop.f32.mrb[0].mxu1 }
  0xdb   :  { %v2101_v45 = vpop.f32.mrb[1].mxu1 }
  0xdc   :  { %v164_v46 = vpop.f32.mrb[2].mxu1 }
  0xdd   :  { %v2102_v47 = vpop.f32.mrb[3].mxu1 }
 0x150   :  { %v112_v48 = vpop.f32.mrb[0].mxu0 }
 0x151   :  { %v162_v49 = vadd.f32 %v161_v44, %v112_v48  ;;  %v2095_v50 = vpop.f32.mrb[1].mxu0  ;;  %v983_v44 = vpop.permute.xlu0 %982 }
 0x152   :  { %v115_v51 = vpop.f32.mrb[2].mxu0 }
 0x153   :  { %v2096_v52 = vpop.f32.mrb[3].mxu0  ;;  %v2680_v51 = vld [vmem:[%s3171_s0 + $0x10] ss:$8 sps:$4 sm:$0xff]  }
 0x154   :  { %v266_v53 = vpop.f32.mrb[4].mxu1 }
 0x155   :  { %v2113_v54 = vpop.f32.mrb[5].mxu1  ;;  %v1082_v46 = vpop.permute.xlu0 %1081 }
 0x156   :  { %v269_v55 = vpop.f32.mrb[6].mxu1 }
 0x157   :  { %v2114_v56 = vpop.f32.mrb[7].mxu1  ;;  %v1902_v55 = vld [vmem:[%s3172_s1 + $0x4] sm:$0xf] }
 0x158   :  { %v213_v57 = vpop.f32.mrb[4].mxu0 }
 0x159   :  { %v219_v58 = vadd.f32 %v213_v57, %v162_v49  ;;  %v2107_v59 = vpop.f32.mrb[5].mxu0 }
 0x15a   :  { %v216_v60 = vpop.f32.mrb[6].mxu0 }
 0x15b   :  { %v272_v62 = vadd.f32 %v266_v53, %v219_v58  ;;  %v2108_v63 = vpop.f32.mrb[7].mxu0  ;;  %v1133_v53 = vpop.permute.xlu0 %1132  ;;  %v967_v58 = vld [vmem:[%s3172_s1] sm:$0xf]  ;;  %v1910_v60 = vld [vmem:[%s3172_s1 + $0x8] sm:$0xf] }
 0x15d   :  { %v278_v0 = vadd.f32 %v2909_v61, %v272_v62  ;;  %v1912_v62 = vld [vmem:[%s3172_s1 + $0xc] sm:$0xf] }
 0x15f   :  { %v349_v1 = vmul.f32 %v278_v0, %v278_v0  ;;  %2148 = vmatmul.mubr.f32.vlgmr.msra.gmra.mrb[8].mxu0 %v278_v0 }
 0x160   :  { %2187 = vmatprep.mubr.msk.f32.mxu0 %vm2716_vm0, %v2715_v2 }
 0x161   :  { %2183 = vmatmul.mubr.f32.vlgmr.msra.gmra.mrb[8].mxu1 %v349_v1 }
 0x162   :  { %2192 = vmatprep.mubr.msk.f32.mxu1 %vm2716_vm0, %v2715_v2 }
 0x232   :  { %v345_v4 = vpop.f32.mrb[8].mxu0 }
 0x233   :  { %v2149_v5 = vpop.f32.mrb[9].mxu0  ;;  %2186 = vmatpush3.msra.mxu0 %v345_v4 }
 0x234   :  { %v416_v6 = vpop.f32.mrb[8].mxu1  ;;  %2188 = vmatmul.mubr.msk.f32.vlgmr.msra.gmra.mrb[10].mxu0 %vm420_vm5, %v2919_v3  ;;  %2195 = vmatprep.subr.mxu0 %v2715_v2 }
 0x235   :  { %v2184_v7 = vpop.f32.mrb[9].mxu1  ;;  %2191 = vmatpush3.msra.mxu1 %v416_v6  ;;  %2197 = vmatprep.mubr.msk.f32.mxu0 %vm2716_vm0, %v2715_v2 }
 0x236   :  { %2193 = vmatmul.mubr.msk.f32.vlgmr.msra.gmra.mrb[10].mxu1 %vm420_vm5, %v2919_v3  ;;  %2517 = vmatprep.subr.bf16.mxu1 %v2719_v20 }
 0x237   :  { %2519 = vmatpush3.bf16.msra.mxu1 %v2809_v21  ;;  %2232 = vmatprep.mubr.msk.f32.mxu1 %vm2716_vm0, %v2715_v2 }
 0x238   :  { %2520 = vmatprep.subr.bf16.mxu1 %v2719_v20 }
 0x23b   :  { %2522 = vmatpush3.bf16.msra.mxu1 %v2826_v25 }
 0x23c   :  { %2523 = vmatprep.subr.bf16.mxu1 %v2719_v20 }
 0x23f   :  { %2525 = vmatpush3.bf16.msra.mxu1 %v2839_v28 }
 0x240   :  { %2526 = vmatprep.subr.bf16.mxu1 %v2719_v20 }
 0x243   :  { %2528 = vmatpush3.bf16.msra.mxu1 %v2853_v31 }
 0x244   :  { %2529 = vmatprep.subr.bf16.mxu1 %v2719_v20 }
 0x247   :  { %2531 = vmatpush3.bf16.msra.mxu1 %v2867_v34 }
 0x248   :  { %2532 = vmatprep.subr.bf16.mxu1 %v2719_v20 }
 0x24b   :  { %2534 = vmatpush3.bf16.msra.mxu1 %v2879_v37 }
 0x24c   :  { %2535 = vmatprep.subr.bf16.mxu1 %v2719_v20 }
 0x24f   :  { %2537 = vmatpush3.bf16.msra.mxu1 %v2891_v40 }
 0x250   :  { %2538 = vmatprep.subr.bf16.mxu1 %v2719_v20 }
 0x253   :  { %2540 = vmatpush3.bf16.msra.mxu1 %v2903_v43 }
 0x254   :  { %2270 = vmatprep.subr.mxu1 %v2715_v2 }
 0x307   :  { %v490_v8 = vpop.f32.mrb[10].mxu0 }
 0x308   :  { %v564_v9 = vmul.f32 0.015625, %v490_v8  ;;  %v2189_v10 = vpop.f32.mrb[11].mxu0 }
 0x309   :  { %v560_v11 = vpop.f32.mrb[10].mxu1 }
 0x30a   :  { %v566_v12 = vmul.f32 %v564_v9, %v564_v9  ;;  %v565_v13 = vmul.f32 0.015625, %v560_v11  ;;  %v2194_v14 = vpop.f32.mrb[11].mxu1 }
 0x30c   :  { %v567_v15 = vsub.f32 %v565_v13, %v566_v12 }
 0x30e   :  { %v568_v16 = vadd.f32 1e-05, %v567_v15 }
 0x310   :  { %2681 = vrsqrt.f32 %v568_v16 }
 0x31a   :  { %v2682_v18 = vpop.eup %2681 }
 0x31b   :  { %v570_v19 = vmul.f32 %v2682_v18, %v2950_v17 }
 0x31d   :  { %575 = vperm.xlu1 %2672, %v570_v19   ;;  %v571_v23 = vmul.f32 %v570_v19, %v564_v9 }
 0x31f   :  { %v572_v24 = vsub.f32 %v2956_v22, %v571_v23 }
 0x321   :  { %581 = vperm.xlu1 %2672, %v572_v24  }
 0x325   :  { %984 = vrot.lane.b32.xlu1 %v2679_v38, %s2714_s26 }
 0x329   :  { %1083 = vrot.lane.b32.xlu1 %v2679_v38, %s2713_s25 }
 0x32d   :  { %1134 = vrot.lane.b32.xlu1 %v2679_v38, %s2718_s7 }
 0x39c   :  { %v576_v26 = vpop.permute.xlu1 %575 }
 0x39d   :  { %v578_v27 = vmul.f32 %v576_v26, %v278_v0 }
 0x3a0   :  { %v582_v29 = vpop.permute.xlu1 %581 }
 0x3a1   :  { %v584_v30 = vadd.f32 %v582_v29, %v578_v27 }
 0x3a3   :  { %vm585_vm6 = vcmp.gt.f32.partialorder %v584_v30, 0.0  ;;  %v586_v32 = vmul.f32 0.2, %v584_v30 }
 0x3a4   :  { %v985_v45 = vpop.permute.xlu1 %984 }
 0x3a5   :  { %v587_v35 = vsel %vm585_vm6, %v584_v30, %v586_v32  ;;  %v986_v49 = vsel %vm71_vm2, %v983_v44, %v985_v45 }
 0x3a6   :  { %2196 = vmatpush3.msra.mxu0 %v587_v35 }
 0x3a7   :  { %2198 = vmatmul.mubr.msk.f32.vlgmr.msra.gmra.mrb[12].mxu0 %vm420_vm5, %v2962_v33  ;;  %2541 = vmatprep.subr.bf16.mxu0 %v2719_v20 }
 0x3a8   :  { %2543 = vmatpush3.bf16.msra.mxu0 %v2809_v21  ;;  %2267 = vmatprep.mubr.msk.f32.mxu0 %vm2716_vm0, %v2715_v2  ;;  %v1084_v47 = vpop.permute.xlu1 %1083 }
 0x3a9   :  { %2544 = vmatprep.subr.bf16.mxu0 %v2719_v20  ;;  %v1085_v57 = vsel %vm173_vm3, %v1082_v46, %v1084_v47 }
 0x3ac   :  { %2546 = vmatpush3.bf16.msra.mxu0 %v2826_v25  ;;  %v1135_v56 = vpop.permute.xlu1 %1134 }
 0x3ad   :  { %2547 = vmatprep.subr.bf16.mxu0 %v2719_v20  ;;  %v1136_v59 = vsel %vm226_vm4, %v1133_v53, %v1135_v56 }
 0x3b0   :  { %2549 = vmatpush3.bf16.msra.mxu0 %v2839_v28 }
 0x3b1   :  { %2550 = vmatprep.subr.bf16.mxu0 %v2719_v20 }
 0x3b4   :  { %2552 = vmatpush3.bf16.msra.mxu0 %v2853_v31 }
 0x3b5   :  { %2553 = vmatprep.subr.bf16.mxu0 %v2719_v20 }
 0x3b8   :  { %2555 = vmatpush3.bf16.msra.mxu0 %v2867_v34 }
 0x3b9   :  { %2556 = vmatprep.subr.bf16.mxu0 %v2719_v20 }
 0x3bc   :  { %2558 = vmatpush3.bf16.msra.mxu0 %v2879_v37 }
 0x3bd   :  { %2559 = vmatprep.subr.bf16.mxu0 %v2719_v20 }
 0x3c0   :  { %2561 = vmatpush3.bf16.msra.mxu0 %v2891_v40 }
 0x3c1   :  { %2562 = vmatprep.subr.bf16.mxu0 %v2719_v20 }
 0x3c4   :  { %2564 = vmatpush3.bf16.msra.mxu0 %v2903_v43 }
 0x3c5   :  { %2275 = vmatprep.subr.mxu0 %v2715_v2 }
 0x47a   :  { %v2997_v39 = vpop.f32.mrb[12].mxu0 }
 0x47b   :  { %v731_v41 = vmul.f32 %v2997_v39, %v2997_v39  ;;  %v2199_v42 = vpop.f32.mrb[13].mxu0  ;;  %2233 = vmatmul.mubr.f32.vlgmr.msra.gmra.mrb[12].mxu1 %v2997_v39 }
 0x47c   :  { %2272 = vmatprep.mubr.msk.f32.mxu1 %vm2716_vm0, %v2715_v2  ;;  %v3086_v42 = vld [vmem:[%s3173_s2 + $0x18] sm:$0xff] }
 0x47d   :  { %2268 = vmatmul.mubr.f32.vlgmr.msra.gmra.mrb[14].mxu0 %v731_v41 }
 0x47e   :  { %2277 = vmatprep.mubr.msk.f32.mxu0 %vm2716_vm0, %v2715_v2 }
 0x54e   :  { %v727_v48 = vpop.f32.mrb[12].mxu1 }
 0x54f   :  { %v2234_v50 = vpop.f32.mrb[13].mxu1  ;;  %2271 = vmatpush3.msra.mxu1 %v727_v48 }
 0x550   :  { %v798_v52 = vpop.f32.mrb[14].mxu0  ;;  %2273 = vmatmul.mubr.msk.f32.vlgmr.msra.gmra.mrb[14].mxu1 %vm420_vm5, %v2919_v3  ;;  %2280 = vmatprep.subr.bf16.mxu1 %v2715_v2 }
 0x551   :  { %v2269_v54 = vpop.f32.mrb[15].mxu0  ;;  %2276 = vmatpush3.msra.mxu0 %v798_v52  ;;  %2281 = vmatpush3.bf16.msra.mxu1 %v986_v49 }
 0x552   :  { %2278 = vmatmul.mubr.msk.f32.vlgmr.msra.gmra.mrb[16].mxu0 %vm420_vm5, %v2919_v3  ;;  %2286 = vmatprep.subr.bf16.mxu0 %v2715_v2 }
 0x553   :  { %2282 = vmatprep.mubr.msk.bf16.mxu1 %vm2716_vm0, %v2715_v2  ;;  %2287 = vmatpush3.bf16.msra.mxu0 %v2680_v51 }
 0x554   :  { %2283 = vmatmul.mubr.msk.bf16.vlgmr.msra.gmra.mrb[16].mxu1 %vm74_vm1, %v1902_v55  ;;  %2292 = vmatprep.subr.bf16.mxu1 %v2715_v2 }
 0x555   :  { %2288 = vmatprep.mubr.msk.bf16.mxu0 %vm2716_vm0, %v2715_v2  ;;  %2293 = vmatpush3.bf16.msra.mxu1 %v1085_v57 }
 0x556   :  { %2289 = vmatmul.mubr.msk.bf16.vlgmr.msra.gmra.mrb[20].mxu0 %vm74_vm1, %v967_v58  ;;  %2298 = vmatprep.subr.bf16.mxu0 %v2715_v2 }
 0x557   :  { %2299 = vmatpush3.bf16.msra.mxu0 %v1136_v59  ;;  %2294 = vmatprep.mubr.msk.bf16.mxu1 %vm2716_vm0, %v2715_v2 }
 0x558   :  { %2300 = vmatprep.mubr.msk.bf16.mxu0 %vm2716_vm0, %v2715_v2  ;;  %2565 = vmatprep.subr.bf16.mxu1 %v2719_v20 }
 0x559   :  { %2589 = vmatprep.subr.bf16.mxu0 %v2719_v20 }
 0x55c   :  { %2295 = vmatmul.mubr.msk.bf16.vlgmr.msra.gmra.mrb[20].mxu1 %vm74_vm1, %v1910_v60 }
 0x55d   :  { %2567 = vmatpush3.bf16.msra.mxu1 %v2809_v21  ;;  %2336 = vmatprep.mubr.msk.f32.mxu1 %vm2716_vm0, %v2715_v2 }
 0x55e   :  { %2301 = vmatmul.mubr.msk.bf16.vlgmr.msra.gmra.mrb[24].mxu0 %vm74_vm1, %v1912_v62  ;;  %2568 = vmatprep.subr.bf16.mxu1 %v2719_v20 }
 0x55f   :  { %2591 = vmatpush3.bf16.msra.mxu0 %v2809_v21  ;;  %2371 = vmatprep.mubr.msk.f32.mxu0 %vm2716_vm0, %v2715_v2 }
 0x560   :  { %2592 = vmatprep.subr.bf16.mxu0 %v2719_v20 }
 0x561   :  { %2570 = vmatpush3.bf16.msra.mxu1 %v2826_v25 }
 0x562   :  { %2571 = vmatprep.subr.bf16.mxu1 %v2719_v20 }
 0x563   :  { %2594 = vmatpush3.bf16.msra.mxu0 %v2826_v25 }
 0x564   :  { %2595 = vmatprep.subr.bf16.mxu0 %v2719_v20 }
 0x565   :  { %2573 = vmatpush3.bf16.msra.mxu1 %v2839_v28 }
 0x566   :  { %2574 = vmatprep.subr.bf16.mxu1 %v2719_v20 }
 0x567   :  { %2597 = vmatpush3.bf16.msra.mxu0 %v2839_v28 }
 0x568   :  { %2598 = vmatprep.subr.bf16.mxu0 %v2719_v20 }
 0x569   :  { %2576 = vmatpush3.bf16.msra.mxu1 %v2853_v31 }
 0x56a   :  { %2577 = vmatprep.subr.bf16.mxu1 %v2719_v20 }
 0x56b   :  { %2600 = vmatpush3.bf16.msra.mxu0 %v2853_v31 }
 0x56c   :  { %2601 = vmatprep.subr.bf16.mxu0 %v2719_v20 }
 0x56d   :  { %2579 = vmatpush3.bf16.msra.mxu1 %v2867_v34 }
 0x56e   :  { %2580 = vmatprep.subr.bf16.mxu1 %v2719_v20 }
 0x56f   :  { %2603 = vmatpush3.bf16.msra.mxu0 %v2867_v34 }
 0x570   :  { %2604 = vmatprep.subr.bf16.mxu0 %v2719_v20 }
 0x571   :  { %2582 = vmatpush3.bf16.msra.mxu1 %v2879_v37 }
 0x572   :  { %2583 = vmatprep.subr.bf16.mxu1 %v2719_v20 }
 0x573   :  { %2606 = vmatpush3.bf16.msra.mxu0 %v2879_v37 }
 0x574   :  { %2607 = vmatprep.subr.bf16.mxu0 %v2719_v20 }
 0x575   :  { %2585 = vmatpush3.bf16.msra.mxu1 %v2891_v40 }
 0x576   :  { %2586 = vmatprep.subr.bf16.mxu1 %v2719_v20 }
 0x577   :  { %2609 = vmatpush3.bf16.msra.mxu0 %v2891_v40 }
 0x578   :  { %2610 = vmatprep.subr.bf16.mxu0 %v2719_v20 }
 0x579   :  { %2588 = vmatpush3.bf16.msra.mxu1 %v2903_v43 }
 0x57a   :  { %2374 = vmatprep.subr.mxu1 %v2715_v2 }
 0x57b   :  { %2612 = vmatpush3.bf16.msra.mxu0 %v2903_v43 }
 0x57c   :  { %2379 = vmatprep.subr.mxu0 %v2715_v2 }
 0x623   :  { %v868_v63 = vpop.f32.mrb[14].mxu1 }
 0x624   :  { %v942_v0 = vmul.f32 0.015625, %v868_v63  ;;  %v2274_v1 = vpop.f32.mrb[15].mxu1 }
 0x625   :  { %v938_v4 = vpop.f32.mrb[16].mxu0  ;;  %v3124_v1 = vld [vmem:[%s3173_s2 + $0x20] sm:$0xff]  ;;  %s2720_s2 = smov [#allocation2]  }
 0x626   :  { %v944_v5 = vmul.f32 %v942_v0, %v942_v0  ;;  %v943_v6 = vmul.f32 0.015625, %v938_v4  ;;  %v2279_v7 = vpop.f32.mrb[17].mxu0  ;;  %s1870_s24 = sshll.u32 %s2720_s2, 4  ;;  %s1871_s24 = int_to_ptr.vmem [resolvable:$true] %s1870_s24 }
 0x627   :  { %v1025_v8 = vpop.f32.mrb[16].mxu1  ;;  %s2689_s27 = scalar_lea.vmem %s1871_s24, 256  ;;  %p2694_p1 = scmp.lt.s32.totalorder %s1871_s24, %s1871_s24 }
 0x628   :  { %v945_v9 = vsub.f32 %v943_v6, %v944_v5  ;;  %v2284_v10 = vpop.f32.mrb[17].mxu1  ;;  %p2690_p0 = scmp.ne.s32.totalorder %s1871_s24, %s2689_s27  ;;  %p2695_p2 = scmp.lt.s32.totalorder %s2689_s27, %s2689_s27 }
 0x629   :  { %v1028_v11 = vpop.f32.mrb[18].mxu1  ;;  %v1074_v12 = vpop.f32.mrb[20].mxu0 }
 0x62a   :  { %v946_v13 = vadd.f32 1e-05, %v945_v9  ;;  %v1075_v14 = vadd.f32 %v1074_v12, %v1025_v8  ;;  %v2285_v15 = vpop.f32.mrb[19].mxu1  ;;  %v2290_v16 = vpop.f32.mrb[21].mxu0  ;;  %p2696_p3 = por %p2695_p2, %p2694_p1 }
 0x62b   :  { %v1077_v18 = vpop.f32.mrb[22].mxu0 }
 0x62c   :  { %2683 = vrsqrt.f32 %v946_v13  ;;  %v2291_v19 = vpop.f32.mrb[23].mxu0  ;;  %p2697_p4 = pnand %p2696_p3, %p2690_p0 }
 0x62f   :  { %v1124_v23 = vpop.f32.mrb[20].mxu1 }
 0x630   :  { %v1130_v24 = vadd.f32 %v1124_v23, %v1075_v14  ;;  %v2296_v26 = vpop.f32.mrb[21].mxu1 }
 0x631   :  { %v1127_v27 = vpop.f32.mrb[22].mxu1  ;;  %v1175_v29 = vpop.f32.mrb[24].mxu0 }
 0x632   :  { %v1181_v30 = vadd.f32 %v1175_v29, %v1130_v24  ;;  %v2297_v32 = vpop.f32.mrb[23].mxu1  ;;  %v2302_v35 = vpop.f32.mrb[25].mxu0 }
 0x633   :  { %v1178_v36 = vpop.f32.mrb[26].mxu0 }
 0x634   :  { %v1182_v38 = vadd.f32 %v1181_v30, %v2909_v61  ;;  %v2303_v41 = vpop.f32.mrb[27].mxu0 }
 0x636   :  { %v2684_v44 = vpop.eup %2683  ;;  %v1253_v45 = vmul.f32 %v1182_v38, %v1182_v38  ;;  %2337 = vmatmul.mubr.f32.vlgmr.msra.gmra.mrb[24].mxu1 %v1182_v38 }
 0x637   :  { %2376 = vmatprep.mubr.msk.f32.mxu1 %vm2716_vm0, %v2715_v2  ;;  %v948_v46 = vmul.f32 %v2684_v44, %v3086_v42 }
 0x638   :  { %2372 = vmatmul.mubr.f32.vlgmr.msra.gmra.mrb[18].mxu0 %v1253_v45 }
 0x639   :  { %2381 = vmatprep.mubr.msk.f32.mxu0 %vm2716_vm0, %v2715_v2  ;;  %v949_v47 = vmul.f32 %v948_v46, %v942_v0 }
 0x63b   :  { %v950_v4 = vsub.f32 %v3124_v1, %v949_v47 }
 0x709   :  { %v1249_v61 = vpop.f32.mrb[24].mxu1 }
 0x70a   :  { %v2338_v48 = vpop.f32.mrb[25].mxu1  ;;  %2375 = vmatpush3.msra.mxu1 %v1249_v61 }
 0x70b   :  { %v1320_v49 = vpop.f32.mrb[18].mxu0  ;;  %2377 = vmatmul.mubr.msk.f32.vlgmr.msra.gmra.mrb[26].mxu1 %vm420_vm5, %v2919_v3  ;;  %2384 = vmatprep.subr.mxu1 %v2715_v2 }
 0x70c   :  { %v2373_v50 = vpop.f32.mrb[19].mxu0  ;;  %2380 = vmatpush3.msra.mxu0 %v1320_v49  ;;  %2386 = vmatprep.mubr.msk.f32.mxu1 %vm2716_vm0, %v2715_v2 }
 0x70d   :  { %2382 = vmatmul.mubr.msk.f32.vlgmr.msra.gmra.mrb[28].mxu0 %vm420_vm5, %v2919_v3  ;;  %2613 = vmatprep.subr.bf16.mxu0 %v2719_v20 }
 0x70e   :  { %2615 = vmatpush3.bf16.msra.mxu0 %v2809_v21  ;;  %2421 = vmatprep.mubr.msk.f32.mxu0 %vm2716_vm0, %v2715_v2 }
 0x70f   :  { %2616 = vmatprep.subr.bf16.mxu0 %v2719_v20 }
 0x712   :  { %2618 = vmatpush3.bf16.msra.mxu0 %v2826_v25 }
 0x713   :  { %2619 = vmatprep.subr.bf16.mxu0 %v2719_v20 }
 0x716   :  { %2621 = vmatpush3.bf16.msra.mxu0 %v2839_v28 }
 0x717   :  { %2622 = vmatprep.subr.bf16.mxu0 %v2719_v20 }
 0x71a   :  { %2624 = vmatpush3.bf16.msra.mxu0 %v2853_v31 }
 0x71b   :  { %2625 = vmatprep.subr.bf16.mxu0 %v2719_v20 }
 0x71e   :  { %2627 = vmatpush3.bf16.msra.mxu0 %v2867_v34 }
 0x71f   :  { %2628 = vmatprep.subr.bf16.mxu0 %v2719_v20 }
 0x722   :  { %2630 = vmatpush3.bf16.msra.mxu0 %v2879_v37 }
 0x723   :  { %2631 = vmatprep.subr.bf16.mxu0 %v2719_v20 }
 0x726   :  { %2633 = vmatpush3.bf16.msra.mxu0 %v2891_v40 }
 0x727   :  { %2634 = vmatprep.subr.bf16.mxu0 %v2719_v20 }
 0x72a   :  { %2636 = vmatpush3.bf16.msra.mxu0 %v2903_v43 }
 0x72b   :  { %2459 = vmatprep.subr.mxu0 %v2715_v2 }
 0x7de   :  { %v1390_v51 = vpop.f32.mrb[26].mxu1 }
 0x7df   :  { %v1464_v52 = vmul.f32 0.015625, %v1390_v51  ;;  %v2378_v53 = vpop.f32.mrb[27].mxu1 }
 0x7e0   :  { %v1460_v54 = vpop.f32.mrb[28].mxu0 }
 0x7e1   :  { %v1466_v55 = vmul.f32 %v1464_v52, %v1464_v52  ;;  %v1465_v56 = vmul.f32 0.015625, %v1460_v54  ;;  %v2383_v57 = vpop.f32.mrb[29].mxu0 }
 0x7e3   :  { %v1467_v58 = vsub.f32 %v1465_v56, %v1466_v55 }
 0x7e5   :  { %v1468_v59 = vadd.f32 1e-05, %v1467_v58 }
 0x7e7   :  { %2685 = vrsqrt.f32 %v1468_v59 }
 0x7f1   :  { %v2686_v60 = vpop.eup %2685 }
 0x7f2   :  { %v1470_v62 = vmul.f32 %v2686_v60, %v2950_v17 }
 0x7f4   :  { %1475 = vperm.xlu0 %2671, %v1470_v62   ;;  %v1471_v63 = vmul.f32 %v1470_v62, %v1464_v52 }
 0x7f6   :  { %v1472_v0 = vsub.f32 %v2956_v22, %v1471_v63 }
 0x7f8   :  { %953 = vperm.xlu0 %2671, %v948_v46   ;;  %1481 = vperm.xlu1 %2672, %v1472_v0  }
 0x7fc   :  { %959 = vperm.xlu0 %2671, %v950_v4  }
 0x873   :  { %v1476_v5 = vpop.permute.xlu0 %1475 }
 0x874   :  { %v1478_v6 = vmul.f32 %v1476_v5, %v1182_v38 }
 0x877   :  { %v954_v7 = vpop.permute.xlu0 %953  ;;  %v1482_v8 = vpop.permute.xlu1 %1481 }
 0x878   :  { %v1484_v9 = vadd.f32 %v1482_v8, %v1478_v6  ;;  %v956_v17 = vmul.f32 %v954_v7, %v2997_v39 }
 0x87a   :  { %vm1485_vm7 = vcmp.gt.f32.partialorder %v1484_v9, 0.0  ;;  %v1486_v10 = vmul.f32 0.2, %v1484_v9 }
 0x87b   :  { %v960_v22 = vpop.permute.xlu0 %959 }
 0x87c   :  { %v962_v11 = vadd.f32 %v960_v22, %v956_v17  ;;  %v1487_v12 = vsel %vm1485_vm7, %v1484_v9, %v1486_v10 }
 0x87d   :  { %2385 = vmatpush3.msra.mxu1 %v1487_v12 }
 0x87e   :  { %vm963_vm8 = vcmp.gt.f32.partialorder %v962_v11, 0.0  ;;  %v964_v13 = vmul.f32 0.2, %v962_v11  ;;  %2387 = vmatmul.mubr.msk.f32.vlgmr.msra.gmra.mrb[28].mxu1 %vm420_vm5, %v2962_v33  ;;  %2637 = vmatprep.subr.bf16.mxu1 %v2719_v20 }
 0x87f   :  { %2639 = vmatpush3.bf16.msra.mxu1 %v2809_v21  ;;  %2456 = vmatprep.mubr.msk.f32.mxu1 %vm2716_vm0, %v2715_v2 }
 0x880   :  { %v965_v14 = vsel %vm963_vm8, %v962_v11, %v964_v13  ;;  %2640 = vmatprep.subr.bf16.mxu1 %v2719_v20 }
 0x881   :  { %966 = vst [vmem:[#allocation2] sm:$0xff] %v965_v14 }
 0x883   :  { %2642 = vmatpush3.bf16.msra.mxu1 %v2826_v25 }
 0x884   :  { %2643 = vmatprep.subr.bf16.mxu1 %v2719_v20 }
 0x887   :  { %2645 = vmatpush3.bf16.msra.mxu1 %v2839_v28 }
 0x888   :  { %2646 = vmatprep.subr.bf16.mxu1 %v2719_v20 }
 0x88b   :  { %2648 = vmatpush3.bf16.msra.mxu1 %v2853_v31 }
 0x88c   :  { %2649 = vmatprep.subr.bf16.mxu1 %v2719_v20 }
 0x88f   :  { %2651 = vmatpush3.bf16.msra.mxu1 %v2867_v34 }
 0x890   :  { %2652 = vmatprep.subr.bf16.mxu1 %v2719_v20 }
 0x893   :  { %2654 = vmatpush3.bf16.msra.mxu1 %v2879_v37 }
 0x894   :  { %2655 = vmatprep.subr.bf16.mxu1 %v2719_v20 }
 0x897   :  { %2657 = vmatpush3.bf16.msra.mxu1 %v2891_v40 }
 0x898   :  { %2658 = vmatprep.subr.bf16.mxu1 %v2719_v20 }
 0x89b   :  { %2660 = vmatpush3.bf16.msra.mxu1 %v2903_v43 }
 0x89c   :  { %2464 = vmatprep.subr.mxu1 %v2715_v2 }
 0x951   :  { %v1554_v21 = vpop.f32.mrb[28].mxu1 }
 0x952   :  { %v1628_v25 = vmul.f32 %v1554_v21, %v1554_v21  ;;  %v2388_v28 = vpop.f32.mrb[29].mxu1  ;;  %2422 = vmatmul.mubr.f32.vlgmr.msra.gmra.mrb[30].mxu0 %v1554_v21 }
 0x953   :  { %2461 = vmatprep.mubr.msk.f32.mxu0 %vm2716_vm0, %v2715_v2 }
 0x954   :  { %2457 = vmatmul.mubr.f32.vlgmr.msra.gmra.mrb[30].mxu1 %v1628_v25 }
 0x955   :  { %2466 = vmatprep.mubr.msk.f32.mxu1 %vm2716_vm0, %v2715_v2 }
 0xa25   :  { %v1624_v31 = vpop.f32.mrb[30].mxu0 }
 0xa26   :  { %v2423_v34 = vpop.f32.mrb[31].mxu0  ;;  %2460 = vmatpush3.msra.mxu0 %v1624_v31 }
 0xa27   :  { %v1695_v37 = vpop.f32.mrb[30].mxu1  ;;  %2462 = vmatmul.mubr.msk.f32.vlgmr.msra.gmra.mrb[32].mxu0 %vm420_vm5, %v2919_v3 }
 0xa28   :  { %v2458_v20 = vpop.f32.mrb[31].mxu1  ;;  %2465 = vmatpush3.msra.mxu1 %v1695_v37 }
 0xa29   :  { %2467 = vmatmul.mubr.msk.f32.vlgmr.msra.gmra.mrb[32].mxu1 %vm420_vm5, %v2919_v3 }
 0xafa   :  { %v1765_v40 = vpop.f32.mrb[32].mxu0 }
 0xafb   :  { %v1839_v43 = vmul.f32 0.015625, %v1765_v40  ;;  %v2463_v33 = vpop.f32.mrb[33].mxu0 }
 0xafc   :  { %v1835_v39 = vpop.f32.mrb[32].mxu1 }
 0xafd   :  { %v1841_v15 = vmul.f32 %v1839_v43, %v1839_v43  ;;  %v1840_v16 = vmul.f32 0.015625, %v1835_v39  ;;  %v2468_v18 = vpop.f32.mrb[33].mxu1 }
 0xaff   :  { %v1842_v2 = vsub.f32 %v1840_v16, %v1841_v15 }
 0xb01   :  { %v1843_v19 = vadd.f32 1e-05, %v1842_v2 }
 0xb03   :  { %2687 = vrsqrt.f32 %v1843_v19 }
 0xb0d   :  { %v2688_v23 = vpop.eup %2687 }
 0xb0e   :  { %v1845_v24 = vmul.f32 %v2688_v23, %v3086_v42 }
 0xb10   :  { %1850 = vperm.xlu1 %2672, %v1845_v24   ;;  %v1846_v26 = vmul.f32 %v1845_v24, %v1839_v43 }
 0xb12   :  { %v1847_v27 = vsub.f32 %v3124_v1, %v1846_v26 }
 0xb14   :  { %1856 = vperm.xlu1 %2672, %v1847_v27  }
 0xb8f   :  { %v1851_v29 = vpop.permute.xlu1 %1850 }
 0xb90   :  { %v1853_v3 = vmul.f32 %v1851_v29, %v1554_v21 }
 0xb93   :  { %v1857_v30 = vpop.permute.xlu1 %1856 }
 0xb94   :  { %v1859_v32 = vadd.f32 %v1857_v30, %v1853_v3 }
 0xb96   :  { %vm1860_vm9 = vcmp.gt.f32.partialorder %v1859_v32, 0.0  ;;  %v1861_v35 = vmul.f32 0.2, %v1859_v32 }
 0xb98   :  { %v1862_v36 = vsel %vm1860_vm9, %v1859_v32, %v1861_v35 }
 0xb99   :  { %1864 = vst [vmem:[#allocation2 + $0x8] sm:$0xff] %v1862_v36 }
 0xb9a   :  { %2700 = shalt.err (!%p2697_p4)
}
 0xb9b   :  { %s2701_s29 = scalar_lea.hbm %s3177_s6, 256 }
 0xb9c   :  { %p2702_p5 = scmp.ne.s32.totalorder %s3177_s6, %s2701_s29  ;;  %p2705_p6 = scmp.lt.u32.totalorder %s2701_s29, %s3177_s6 }
 0xb9e   :  { %p2707_p7 = pnand %p2705_p6, %p2702_p5 }
 0xba0   :  { %2710 = shalt.err (!%p2707_p7)
}
 0xba1   :  { %s2721_s10 = smov 128   ;;  %s2722_s11 = smov 8  }
 0xba2   :  { %1876 = dma.vmem_to_hbm [thread:$0]  %s1871_s24, 256, %s3177_s6, [#allocation3], %s2721_s10, %s2721_s10, %s2722_s11  }
 0xba3   :  { %2711 = dma.done.wait [#allocation3], 256  }
 0xba4   :  { %2712 = vsyncadd [#allocation3], 4294967040 }
 0xba5   :  { %1880 = vsyncpa [#allocation3], 1 }

</bundles_post_ra>
